<compile_context>
chip_gen: v7x
topology: tpu7x:2x2x1
jax: 0.10.0
libtpu: 0.0.40
codegen_flags: <defaults>
</compile_context>

<pallas_src>
import math

import jax
import jax.numpy as jnp
from jax.experimental import pallas as pl
from jax.experimental.pallas import tpu as pltpu


def _cdiv(a, b):
    return -(-a // b)


def _round_up(x, m):
    return ((x + m - 1) // m) * m


def _decoder_kernel(z_ref, w1_ref, b1_ref, w4_ref, b4_ref, out_ref):
    # z_ref:   (L, C, 128) f32 in VMEM  (batch is the trailing two axes)
    # w1_ref:  (L, H) f32 in SMEM,  b1_ref: (H,) f32 in SMEM
    # w4_ref:  (H, O) f32 in SMEM,  b4_ref: (O,) f32 in SMEM
    # out_ref: (O, C, 128) f32 in VMEM
    L, C = z_ref.shape[0], z_ref.shape[1]
    H = w1_ref.shape[1]
    O = w4_ref.shape[1]

    # Hoist all scalar weight/bias loads out of the stripe loop (SMEM -> sreg).
    w1 = [[w1_ref[k, j] for j in range(H)] for k in range(L)]
    b1 = [b1_ref[j] for j in range(H)]
    w4 = [[w4_ref[j, o] for o in range(O)] for j in range(H)]
    b4 = [b4_ref[o] for o in range(O)]

    # Process the tile in 8-chunk (1024-row) stripes so live intermediates
    # (L + H + O dense slabs) stay well inside the 64-vreg file.
    stripe = C if C < 8 else 8          # wrapper guarantees C % 8 == 0 when C >= 8
    n_stripes = C // stripe

    @pl.loop(0, n_stripes)
    def _(s):
        base = pl.multiple_of(s * stripe, stripe)
        zs = [z_ref[k, pl.ds(base, stripe), :] for k in range(L)]  # (stripe,128)

        # linear1 + tanh: h_j = tanh(b1[j] + sum_k w1[k,j] * z_k)
        h = []
        for j in range(H):
            acc = w1[0][j] * zs[0]
            for k in range(1, L):
                acc = acc + w1[k][j] * zs[k]
            h.append(jnp.tanh(acc + b1[j]))                        # EUP slot

        # linear4: y_o = b4[o] + sum_j w4[j,o] * h_j ; full-width dense store.
        for o in range(O):
            acc = w4[0][o] * h[0]
            for j in range(1, H):
                acc = acc + w4[j][o] * h[j]
            out_ref[o, pl.ds(base, stripe), :] = acc + b4[o]


def decoder_forward(z, params, *, block_b=32768):
    """z: (B, latent_dims) f32; params: dict with w1 (L,6), b1 (6,), w4 (6,9),
    b4 (9,) (weights stored (in, out), transposed vs PyTorch). Returns (B, 9)."""
    z = z.astype(jnp.float32)
    B, L = z.shape
    H = params["w1"].shape[1]          # 6
    O = params["w4"].shape[1]          # 9

    # ---- choose the batch tiling (in 128-row "chunks") -----------------------
    n_chunks = _cdiv(B, 128)
    if n_chunks <= 8:
        # One full-extent tile (block dim == full array dim, so any size is OK).
        tb128, steps = n_chunks, 1
    else:
        max_chunks = max(8, (block_b // 128) // 8 * 8)
        # >= 2 grid steps so v7x's second TensorCore gets work.
        target_steps = max(2, _cdiv(n_chunks, max_chunks))
        tb128 = min(max_chunks, _round_up(_cdiv(n_chunks, target_steps), 8))
        steps = _cdiv(n_chunks, tb128)
    B_pad = steps * tb128 * 128

    # Single fused pad + transpose + reshape into the lane-dense layout
    # (L, B_pad/128, 128).  The transpose is required for the lane-dense layout
    # anyway; folding the pad into it avoids a second full copy of z.
    z_p = jnp.pad(z, ((0, B_pad - B), (0, 0))) if B_pad != B else z
    z_t = z_p.T.reshape(L, B_pad // 128, 128)

    out = pl.pallas_call(
        _decoder_kernel,
        out_shape=jax.ShapeDtypeStruct((O, B_pad // 128, 128), jnp.float32),
        grid=(steps,),
        in_specs=[
            # z: streamed per batch tile, lane-dense.
            pl.BlockSpec((L, tb128, 128), lambda i: (0, i, 0)),
            # weights / biases: whole arrays resident in SMEM (scalar reads).
            pl.BlockSpec(memory_space=pltpu.MemorySpace.SMEM),
            pl.BlockSpec(memory_space=pltpu.MemorySpace.SMEM),
            pl.BlockSpec(memory_space=pltpu.MemorySpace.SMEM),
            pl.BlockSpec(memory_space=pltpu.MemorySpace.SMEM),
        ],
        out_specs=pl.BlockSpec((O, tb128, 128), lambda i: (0, i, 0)),
        compiler_params=pltpu.CompilerParams(
            dimension_semantics=("parallel",)),    # 2-TC split on v7x
    )(z_t, params["w1"], params["b1"], params["w4"], params["b4"])

    # (O, chunks, 128) -> (B, O)
    return out.reshape(O, B_pad).T[:B]


def init_params(key, latent_dims):
    """Deterministic init mimicking PyTorch nn.Linear defaults
    (uniform in [-1/sqrt(fan_in), 1/sqrt(fan_in)]). Weights stored (in, out)."""
    def linear(k, fan_in, fan_out):
        kw, kb = jax.random.split(k)
        bound = 1.0 / math.sqrt(fan_in)
        w = jax.random.uniform(kw, (fan_in, fan_out), jnp.float32, -bound, bound)
        b = jax.random.uniform(kb, (fan_out,), jnp.float32, -bound, bound)
        return w, b

    k1, k4 = jax.random.split(key)
    w1, b1 = linear(k1, latent_dims, 6)   # linear1: latent_dims -> 6
    w4, b4 = linear(k4, 6, 9)             # linear4: 6 -> 9
    return {"w1": w1, "b1": b1, "w4": w4, "b4": b4}


def _reference(z, params):
    h = jnp.tanh(z @ params["w1"] + params["b1"])
    return h @ params["w4"] + params["b4"]


if __name__ == "__main__":
    key = jax.random.PRNGKey(0)
    k_z, k_z2, k_p = jax.random.split(key, 3)

    LATENT = 4
    params = init_params(k_p, LATENT)

    # Small demo batch (single tile path).
    B = 8
    z = jax.random.normal(k_z, (B, LATENT), jnp.float32)
    y = decoder_forward(z, params)
    jax.block_until_ready(y)
    y_ref = _reference(z, params)
    assert y.shape == (B, 9)
    assert jnp.allclose(y, y_ref, atol=1e-5), float(jnp.max(jnp.abs(y - y_ref)))

    # Non-divisible batch exercising the multi-step grid + in-kernel stripe loop.
    B2 = 2176
    z2 = jax.random.normal(k_z2, (B2, LATENT), jnp.float32)
    y2 = decoder_forward(z2, params, block_b=2048)
    jax.block_until_ready(y2)
    y2_ref = _reference(z2, params)
    assert y2.shape == (B2, 9)
    assert jnp.allclose(y2, y2_ref, atol=1e-5), float(jnp.max(jnp.abs(y2 - y2_ref)))

    print("KERNEL_OK")
</pallas_src>

<mosaic_0001>
module attributes {stable_mosaic.version = 11 : i64} {
  func.func @_decoder_kernel(%arg0: i32, %arg1: memref<4x1x128xf32, #tpu.memory_space<vmem>>, %arg2: memref<4x6xf32, #tpu.memory_space<smem>>, %arg3: memref<6xf32, #tpu.memory_space<smem>>, %arg4: memref<6x9xf32, #tpu.memory_space<smem>>, %arg5: memref<9xf32, #tpu.memory_space<smem>>, %arg6: memref<9x1x128xf32, #tpu.memory_space<vmem>>) attributes {dimension_semantics = [#tpu.dimension_semantics<parallel>], iteration_bounds = array<i64: 1>, scalar_prefetch = 0 : i64, scratch_operands = 0 : i64, tpu.core_type = #tpu.core_type<tc>, window_params = [{transform_indices = @transform_0, window_bounds = array<i64: 4, 1, 128>}, {transform_indices = @transform_1, window_bounds = array<i64: 4, 6>}, {transform_indices = @transform_2, window_bounds = array<i64: 6>}, {transform_indices = @transform_3, window_bounds = array<i64: 6, 9>}, {transform_indices = @transform_4, window_bounds = array<i64: 9>}, {transform_indices = @transform_5, window_bounds = array<i64: 9, 1, 128>}]} {
    %c0 = arith.constant 0 : index
    %c0_0 = arith.constant 0 : index
    %0 = memref.load %arg2[%c0, %c0_0] : memref<4x6xf32, #tpu.memory_space<smem>>
    %c0_1 = arith.constant 0 : index
    %c1 = arith.constant 1 : index
    %1 = memref.load %arg2[%c0_1, %c1] : memref<4x6xf32, #tpu.memory_space<smem>>
    %c0_2 = arith.constant 0 : index
    %c2 = arith.constant 2 : index
    %2 = memref.load %arg2[%c0_2, %c2] : memref<4x6xf32, #tpu.memory_space<smem>>
    %c0_3 = arith.constant 0 : index
    %c3 = arith.constant 3 : index
    %3 = memref.load %arg2[%c0_3, %c3] : memref<4x6xf32, #tpu.memory_space<smem>>
    %c0_4 = arith.constant 0 : index
    %c4 = arith.constant 4 : index
    %4 = memref.load %arg2[%c0_4, %c4] : memref<4x6xf32, #tpu.memory_space<smem>>
    %c0_5 = arith.constant 0 : index
    %c5 = arith.constant 5 : index
    %5 = memref.load %arg2[%c0_5, %c5] : memref<4x6xf32, #tpu.memory_space<smem>>
    %c1_6 = arith.constant 1 : index
    %c0_7 = arith.constant 0 : index
    %6 = memref.load %arg2[%c1_6, %c0_7] : memref<4x6xf32, #tpu.memory_space<smem>>
    %c1_8 = arith.constant 1 : index
    %c1_9 = arith.constant 1 : index
    %7 = memref.load %arg2[%c1_8, %c1_9] : memref<4x6xf32, #tpu.memory_space<smem>>
    %c1_10 = arith.constant 1 : index
    %c2_11 = arith.constant 2 : index
    %8 = memref.load %arg2[%c1_10, %c2_11] : memref<4x6xf32, #tpu.memory_space<smem>>
    %c1_12 = arith.constant 1 : index
    %c3_13 = arith.constant 3 : index
    %9 = memref.load %arg2[%c1_12, %c3_13] : memref<4x6xf32, #tpu.memory_space<smem>>
    %c1_14 = arith.constant 1 : index
    %c4_15 = arith.constant 4 : index
    %10 = memref.load %arg2[%c1_14, %c4_15] : memref<4x6xf32, #tpu.memory_space<smem>>
    %c1_16 = arith.constant 1 : index
    %c5_17 = arith.constant 5 : index
    %11 = memref.load %arg2[%c1_16, %c5_17] : memref<4x6xf32, #tpu.memory_space<smem>>
    %c2_18 = arith.constant 2 : index
    %c0_19 = arith.constant 0 : index
    %12 = memref.load %arg2[%c2_18, %c0_19] : memref<4x6xf32, #tpu.memory_space<smem>>
    %c2_20 = arith.constant 2 : index
    %c1_21 = arith.constant 1 : index
    %13 = memref.load %arg2[%c2_20, %c1_21] : memref<4x6xf32, #tpu.memory_space<smem>>
    %c2_22 = arith.constant 2 : index
    %c2_23 = arith.constant 2 : index
    %14 = memref.load %arg2[%c2_22, %c2_23] : memref<4x6xf32, #tpu.memory_space<smem>>
    %c2_24 = arith.constant 2 : index
    %c3_25 = arith.constant 3 : index
    %15 = memref.load %arg2[%c2_24, %c3_25] : memref<4x6xf32, #tpu.memory_space<smem>>
    %c2_26 = arith.constant 2 : index
    %c4_27 = arith.constant 4 : index
    %16 = memref.load %arg2[%c2_26, %c4_27] : memref<4x6xf32, #tpu.memory_space<smem>>
    %c2_28 = arith.constant 2 : index
    %c5_29 = arith.constant 5 : index
    %17 = memref.load %arg2[%c2_28, %c5_29] : memref<4x6xf32, #tpu.memory_space<smem>>
    %c3_30 = arith.constant 3 : index
    %c0_31 = arith.constant 0 : index
    %18 = memref.load %arg2[%c3_30, %c0_31] : memref<4x6xf32, #tpu.memory_space<smem>>
    %c3_32 = arith.constant 3 : index
    %c1_33 = arith.constant 1 : index
    %19 = memref.load %arg2[%c3_32, %c1_33] : memref<4x6xf32, #tpu.memory_space<smem>>
    %c3_34 = arith.constant 3 : index
    %c2_35 = arith.constant 2 : index
    %20 = memref.load %arg2[%c3_34, %c2_35] : memref<4x6xf32, #tpu.memory_space<smem>>
    %c3_36 = arith.constant 3 : index
    %c3_37 = arith.constant 3 : index
    %21 = memref.load %arg2[%c3_36, %c3_37] : memref<4x6xf32, #tpu.memory_space<smem>>
    %c3_38 = arith.constant 3 : index
    %c4_39 = arith.constant 4 : index
    %22 = memref.load %arg2[%c3_38, %c4_39] : memref<4x6xf32, #tpu.memory_space<smem>>
    %c3_40 = arith.constant 3 : index
    %c5_41 = arith.constant 5 : index
    %23 = memref.load %arg2[%c3_40, %c5_41] : memref<4x6xf32, #tpu.memory_space<smem>>
    %c0_42 = arith.constant 0 : index
    %24 = memref.load %arg3[%c0_42] : memref<6xf32, #tpu.memory_space<smem>>
    %c1_43 = arith.constant 1 : index
    %25 = memref.load %arg3[%c1_43] : memref<6xf32, #tpu.memory_space<smem>>
    %c2_44 = arith.constant 2 : index
    %26 = memref.load %arg3[%c2_44] : memref<6xf32, #tpu.memory_space<smem>>
    %c3_45 = arith.constant 3 : index
    %27 = memref.load %arg3[%c3_45] : memref<6xf32, #tpu.memory_space<smem>>
    %c4_46 = arith.constant 4 : index
    %28 = memref.load %arg3[%c4_46] : memref<6xf32, #tpu.memory_space<smem>>
    %c5_47 = arith.constant 5 : index
    %29 = memref.load %arg3[%c5_47] : memref<6xf32, #tpu.memory_space<smem>>
    %c0_48 = arith.constant 0 : index
    %c0_49 = arith.constant 0 : index
    %30 = memref.load %arg4[%c0_48, %c0_49] : memref<6x9xf32, #tpu.memory_space<smem>>
    %c0_50 = arith.constant 0 : index
    %c1_51 = arith.constant 1 : index
    %31 = memref.load %arg4[%c0_50, %c1_51] : memref<6x9xf32, #tpu.memory_space<smem>>
    %c0_52 = arith.constant 0 : index
    %c2_53 = arith.constant 2 : index
    %32 = memref.load %arg4[%c0_52, %c2_53] : memref<6x9xf32, #tpu.memory_space<smem>>
    %c0_54 = arith.constant 0 : index
    %c3_55 = arith.constant 3 : index
    %33 = memref.load %arg4[%c0_54, %c3_55] : memref<6x9xf32, #tpu.memory_space<smem>>
    %c0_56 = arith.constant 0 : index
    %c4_57 = arith.constant 4 : index
    %34 = memref.load %arg4[%c0_56, %c4_57] : memref<6x9xf32, #tpu.memory_space<smem>>
    %c0_58 = arith.constant 0 : index
    %c5_59 = arith.constant 5 : index
    %35 = memref.load %arg4[%c0_58, %c5_59] : memref<6x9xf32, #tpu.memory_space<smem>>
    %c0_60 = arith.constant 0 : index
    %c6 = arith.constant 6 : index
    %36 = memref.load %arg4[%c0_60, %c6] : memref<6x9xf32, #tpu.memory_space<smem>>
    %c0_61 = arith.constant 0 : index
    %c7 = arith.constant 7 : index
    %37 = memref.load %arg4[%c0_61, %c7] : memref<6x9xf32, #tpu.memory_space<smem>>
    %c0_62 = arith.constant 0 : index
    %c8 = arith.constant 8 : index
    %38 = memref.load %arg4[%c0_62, %c8] : memref<6x9xf32, #tpu.memory_space<smem>>
    %c1_63 = arith.constant 1 : index
    %c0_64 = arith.constant 0 : index
    %39 = memref.load %arg4[%c1_63, %c0_64] : memref<6x9xf32, #tpu.memory_space<smem>>
    %c1_65 = arith.constant 1 : index
    %c1_66 = arith.constant 1 : index
    %40 = memref.load %arg4[%c1_65, %c1_66] : memref<6x9xf32, #tpu.memory_space<smem>>
    %c1_67 = arith.constant 1 : index
    %c2_68 = arith.constant 2 : index
    %41 = memref.load %arg4[%c1_67, %c2_68] : memref<6x9xf32, #tpu.memory_space<smem>>
    %c1_69 = arith.constant 1 : index
    %c3_70 = arith.constant 3 : index
    %42 = memref.load %arg4[%c1_69, %c3_70] : memref<6x9xf32, #tpu.memory_space<smem>>
    %c1_71 = arith.constant 1 : index
    %c4_72 = arith.constant 4 : index
    %43 = memref.load %arg4[%c1_71, %c4_72] : memref<6x9xf32, #tpu.memory_space<smem>>
    %c1_73 = arith.constant 1 : index
    %c5_74 = arith.constant 5 : index
    %44 = memref.load %arg4[%c1_73, %c5_74] : memref<6x9xf32, #tpu.memory_space<smem>>
    %c1_75 = arith.constant 1 : index
    %c6_76 = arith.constant 6 : index
    %45 = memref.load %arg4[%c1_75, %c6_76] : memref<6x9xf32, #tpu.memory_space<smem>>
    %c1_77 = arith.constant 1 : index
    %c7_78 = arith.constant 7 : index
    %46 = memref.load %arg4[%c1_77, %c7_78] : memref<6x9xf32, #tpu.memory_space<smem>>
    %c1_79 = arith.constant 1 : index
    %c8_80 = arith.constant 8 : index
    %47 = memref.load %arg4[%c1_79, %c8_80] : memref<6x9xf32, #tpu.memory_space<smem>>
    %c2_81 = arith.constant 2 : index
    %c0_82 = arith.constant 0 : index
    %48 = memref.load %arg4[%c2_81, %c0_82] : memref<6x9xf32, #tpu.memory_space<smem>>
    %c2_83 = arith.constant 2 : index
    %c1_84 = arith.constant 1 : index
    %49 = memref.load %arg4[%c2_83, %c1_84] : memref<6x9xf32, #tpu.memory_space<smem>>
    %c2_85 = arith.constant 2 : index
    %c2_86 = arith.constant 2 : index
    %50 = memref.load %arg4[%c2_85, %c2_86] : memref<6x9xf32, #tpu.memory_space<smem>>
    %c2_87 = arith.constant 2 : index
    %c3_88 = arith.constant 3 : index
    %51 = memref.load %arg4[%c2_87, %c3_88] : memref<6x9xf32, #tpu.memory_space<smem>>
    %c2_89 = arith.constant 2 : index
    %c4_90 = arith.constant 4 : index
    %52 = memref.load %arg4[%c2_89, %c4_90] : memref<6x9xf32, #tpu.memory_space<smem>>
    %c2_91 = arith.constant 2 : index
    %c5_92 = arith.constant 5 : index
    %53 = memref.load %arg4[%c2_91, %c5_92] : memref<6x9xf32, #tpu.memory_space<smem>>
    %c2_93 = arith.constant 2 : index
    %c6_94 = arith.constant 6 : index
    %54 = memref.load %arg4[%c2_93, %c6_94] : memref<6x9xf32, #tpu.memory_space<smem>>
    %c2_95 = arith.constant 2 : index
    %c7_96 = arith.constant 7 : index
    %55 = memref.load %arg4[%c2_95, %c7_96] : memref<6x9xf32, #tpu.memory_space<smem>>
    %c2_97 = arith.constant 2 : index
    %c8_98 = arith.constant 8 : index
    %56 = memref.load %arg4[%c2_97, %c8_98] : memref<6x9xf32, #tpu.memory_space<smem>>
    %c3_99 = arith.constant 3 : index
    %c0_100 = arith.constant 0 : index
    %57 = memref.load %arg4[%c3_99, %c0_100] : memref<6x9xf32, #tpu.memory_space<smem>>
    %c3_101 = arith.constant 3 : index
    %c1_102 = arith.constant 1 : index
    %58 = memref.load %arg4[%c3_101, %c1_102] : memref<6x9xf32, #tpu.memory_space<smem>>
    %c3_103 = arith.constant 3 : index
    %c2_104 = arith.constant 2 : index
    %59 = memref.load %arg4[%c3_103, %c2_104] : memref<6x9xf32, #tpu.memory_space<smem>>
    %c3_105 = arith.constant 3 : index
    %c3_106 = arith.constant 3 : index
    %60 = memref.load %arg4[%c3_105, %c3_106] : memref<6x9xf32, #tpu.memory_space<smem>>
    %c3_107 = arith.constant 3 : index
    %c4_108 = arith.constant 4 : index
    %61 = memref.load %arg4[%c3_107, %c4_108] : memref<6x9xf32, #tpu.memory_space<smem>>
    %c3_109 = arith.constant 3 : index
    %c5_110 = arith.constant 5 : index
    %62 = memref.load %arg4[%c3_109, %c5_110] : memref<6x9xf32, #tpu.memory_space<smem>>
    %c3_111 = arith.constant 3 : index
    %c6_112 = arith.constant 6 : index
    %63 = memref.load %arg4[%c3_111, %c6_112] : memref<6x9xf32, #tpu.memory_space<smem>>
    %c3_113 = arith.constant 3 : index
    %c7_114 = arith.constant 7 : index
    %64 = memref.load %arg4[%c3_113, %c7_114] : memref<6x9xf32, #tpu.memory_space<smem>>
    %c3_115 = arith.constant 3 : index
    %c8_116 = arith.constant 8 : index
    %65 = memref.load %arg4[%c3_115, %c8_116] : memref<6x9xf32, #tpu.memory_space<smem>>
    %c4_117 = arith.constant 4 : index
    %c0_118 = arith.constant 0 : index
    %66 = memref.load %arg4[%c4_117, %c0_118] : memref<6x9xf32, #tpu.memory_space<smem>>
    %c4_119 = arith.constant 4 : index
    %c1_120 = arith.constant 1 : index
    %67 = memref.load %arg4[%c4_119, %c1_120] : memref<6x9xf32, #tpu.memory_space<smem>>
    %c4_121 = arith.constant 4 : index
    %c2_122 = arith.constant 2 : index
    %68 = memref.load %arg4[%c4_121, %c2_122] : memref<6x9xf32, #tpu.memory_space<smem>>
    %c4_123 = arith.constant 4 : index
    %c3_124 = arith.constant 3 : index
    %69 = memref.load %arg4[%c4_123, %c3_124] : memref<6x9xf32, #tpu.memory_space<smem>>
    %c4_125 = arith.constant 4 : index
    %c4_126 = arith.constant 4 : index
    %70 = memref.load %arg4[%c4_125, %c4_126] : memref<6x9xf32, #tpu.memory_space<smem>>
    %c4_127 = arith.constant 4 : index
    %c5_128 = arith.constant 5 : index
    %71 = memref.load %arg4[%c4_127, %c5_128] : memref<6x9xf32, #tpu.memory_space<smem>>
    %c4_129 = arith.constant 4 : index
    %c6_130 = arith.constant 6 : index
    %72 = memref.load %arg4[%c4_129, %c6_130] : memref<6x9xf32, #tpu.memory_space<smem>>
    %c4_131 = arith.constant 4 : index
    %c7_132 = arith.constant 7 : index
    %73 = memref.load %arg4[%c4_131, %c7_132] : memref<6x9xf32, #tpu.memory_space<smem>>
    %c4_133 = arith.constant 4 : index
    %c8_134 = arith.constant 8 : index
    %74 = memref.load %arg4[%c4_133, %c8_134] : memref<6x9xf32, #tpu.memory_space<smem>>
    %c5_135 = arith.constant 5 : index
    %c0_136 = arith.constant 0 : index
    %75 = memref.load %arg4[%c5_135, %c0_136] : memref<6x9xf32, #tpu.memory_space<smem>>
    %c5_137 = arith.constant 5 : index
    %c1_138 = arith.constant 1 : index
    %76 = memref.load %arg4[%c5_137, %c1_138] : memref<6x9xf32, #tpu.memory_space<smem>>
    %c5_139 = arith.constant 5 : index
    %c2_140 = arith.constant 2 : index
    %77 = memref.load %arg4[%c5_139, %c2_140] : memref<6x9xf32, #tpu.memory_space<smem>>
    %c5_141 = arith.constant 5 : index
    %c3_142 = arith.constant 3 : index
    %78 = memref.load %arg4[%c5_141, %c3_142] : memref<6x9xf32, #tpu.memory_space<smem>>
    %c5_143 = arith.constant 5 : index
    %c4_144 = arith.constant 4 : index
    %79 = memref.load %arg4[%c5_143, %c4_144] : memref<6x9xf32, #tpu.memory_space<smem>>
    %c5_145 = arith.constant 5 : index
    %c5_146 = arith.constant 5 : index
    %80 = memref.load %arg4[%c5_145, %c5_146] : memref<6x9xf32, #tpu.memory_space<smem>>
    %c5_147 = arith.constant 5 : index
    %c6_148 = arith.constant 6 : index
    %81 = memref.load %arg4[%c5_147, %c6_148] : memref<6x9xf32, #tpu.memory_space<smem>>
    %c5_149 = arith.constant 5 : index
    %c7_150 = arith.constant 7 : index
    %82 = memref.load %arg4[%c5_149, %c7_150] : memref<6x9xf32, #tpu.memory_space<smem>>
    %c5_151 = arith.constant 5 : index
    %c8_152 = arith.constant 8 : index
    %83 = memref.load %arg4[%c5_151, %c8_152] : memref<6x9xf32, #tpu.memory_space<smem>>
    %c0_153 = arith.constant 0 : index
    %84 = memref.load %arg5[%c0_153] : memref<9xf32, #tpu.memory_space<smem>>
    %c1_154 = arith.constant 1 : index
    %85 = memref.load %arg5[%c1_154] : memref<9xf32, #tpu.memory_space<smem>>
    %c2_155 = arith.constant 2 : index
    %86 = memref.load %arg5[%c2_155] : memref<9xf32, #tpu.memory_space<smem>>
    %c3_156 = arith.constant 3 : index
    %87 = memref.load %arg5[%c3_156] : memref<9xf32, #tpu.memory_space<smem>>
    %c4_157 = arith.constant 4 : index
    %88 = memref.load %arg5[%c4_157] : memref<9xf32, #tpu.memory_space<smem>>
    %c5_158 = arith.constant 5 : index
    %89 = memref.load %arg5[%c5_158] : memref<9xf32, #tpu.memory_space<smem>>
    %c6_159 = arith.constant 6 : index
    %90 = memref.load %arg5[%c6_159] : memref<9xf32, #tpu.memory_space<smem>>
    %c7_160 = arith.constant 7 : index
    %91 = memref.load %arg5[%c7_160] : memref<9xf32, #tpu.memory_space<smem>>
    %c8_161 = arith.constant 8 : index
    %92 = memref.load %arg5[%c8_161] : memref<9xf32, #tpu.memory_space<smem>>
    %c0_i32 = arith.constant 0 : i32
    %c1_i32 = arith.constant 1 : i32
    %93 = arith.muli %c0_i32, %c1_i32 : i32
    %c0_i32_162 = arith.constant 0 : i32
    %94 = arith.addi %c0_i32_162, %93 : i32
    %c1_i32_163 = arith.constant 1 : i32
    %95 = arith.muli %94, %c1_i32_163 : i32
    %96 = tpu.assume_multiple %95, 1 : i32
    %c0_164 = arith.constant 0 : index
    %97 = arith.index_cast %96 : i32 to index
    %c0_165 = arith.constant 0 : index
    %98 = vector.load %arg1[%c0_164, %97, %c0_165] : memref<4x1x128xf32, #tpu.memory_space<vmem>>, vector<1x1x128xf32>
    %99 = vector.shape_cast %98 : vector<1x1x128xf32> to vector<1x128xf32>
    %c1_166 = arith.constant 1 : index
    %100 = arith.index_cast %96 : i32 to index
    %c0_167 = arith.constant 0 : index
    %101 = vector.load %arg1[%c1_166, %100, %c0_167] : memref<4x1x128xf32, #tpu.memory_space<vmem>>, vector<1x1x128xf32>
    %102 = vector.shape_cast %101 : vector<1x1x128xf32> to vector<1x128xf32>
    %c2_168 = arith.constant 2 : index
    %103 = arith.index_cast %96 : i32 to index
    %c0_169 = arith.constant 0 : index
    %104 = vector.load %arg1[%c2_168, %103, %c0_169] : memref<4x1x128xf32, #tpu.memory_space<vmem>>, vector<1x1x128xf32>
    %105 = vector.shape_cast %104 : vector<1x1x128xf32> to vector<1x128xf32>
    %c3_170 = arith.constant 3 : index
    %106 = arith.index_cast %96 : i32 to index
    %c0_171 = arith.constant 0 : index
    %107 = vector.load %arg1[%c3_170, %106, %c0_171] : memref<4x1x128xf32, #tpu.memory_space<vmem>>, vector<1x1x128xf32>
    %108 = vector.shape_cast %107 : vector<1x1x128xf32> to vector<1x128xf32>
    %109 = vector.broadcast %0 : f32 to vector<1x128xf32>
    %110 = arith.mulf %109, %99 : vector<1x128xf32>
    %111 = vector.broadcast %6 : f32 to vector<1x128xf32>
    %112 = arith.mulf %111, %102 : vector<1x128xf32>
    %113 = arith.addf %110, %112 : vector<1x128xf32>
    %114 = vector.broadcast %12 : f32 to vector<1x128xf32>
    %115 = arith.mulf %114, %105 : vector<1x128xf32>
    %116 = arith.addf %113, %115 : vector<1x128xf32>
    %117 = vector.broadcast %18 : f32 to vector<1x128xf32>
    %118 = arith.mulf %117, %108 : vector<1x128xf32>
    %119 = arith.addf %116, %118 : vector<1x128xf32>
    %120 = vector.broadcast %24 : f32 to vector<1x128xf32>
    %121 = arith.addf %119, %120 : vector<1x128xf32>
    %122 = math.tanh %121 : vector<1x128xf32>
    %123 = vector.broadcast %1 : f32 to vector<1x128xf32>
    %124 = arith.mulf %123, %99 : vector<1x128xf32>
    %125 = vector.broadcast %7 : f32 to vector<1x128xf32>
    %126 = arith.mulf %125, %102 : vector<1x128xf32>
    %127 = arith.addf %124, %126 : vector<1x128xf32>
    %128 = vector.broadcast %13 : f32 to vector<1x128xf32>
    %129 = arith.mulf %128, %105 : vector<1x128xf32>
    %130 = arith.addf %127, %129 : vector<1x128xf32>
    %131 = vector.broadcast %19 : f32 to vector<1x128xf32>
    %132 = arith.mulf %131, %108 : vector<1x128xf32>
    %133 = arith.addf %130, %132 : vector<1x128xf32>
    %134 = vector.broadcast %25 : f32 to vector<1x128xf32>
    %135 = arith.addf %133, %134 : vector<1x128xf32>
    %136 = math.tanh %135 : vector<1x128xf32>
    %137 = vector.broadcast %2 : f32 to vector<1x128xf32>
    %138 = arith.mulf %137, %99 : vector<1x128xf32>
    %139 = vector.broadcast %8 : f32 to vector<1x128xf32>
    %140 = arith.mulf %139, %102 : vector<1x128xf32>
    %141 = arith.addf %138, %140 : vector<1x128xf32>
    %142 = vector.broadcast %14 : f32 to vector<1x128xf32>
    %143 = arith.mulf %142, %105 : vector<1x128xf32>
    %144 = arith.addf %141, %143 : vector<1x128xf32>
    %145 = vector.broadcast %20 : f32 to vector<1x128xf32>
    %146 = arith.mulf %145, %108 : vector<1x128xf32>
    %147 = arith.addf %144, %146 : vector<1x128xf32>
    %148 = vector.broadcast %26 : f32 to vector<1x128xf32>
    %149 = arith.addf %147, %148 : vector<1x128xf32>
    %150 = math.tanh %149 : vector<1x128xf32>
    %151 = vector.broadcast %3 : f32 to vector<1x128xf32>
    %152 = arith.mulf %151, %99 : vector<1x128xf32>
    %153 = vector.broadcast %9 : f32 to vector<1x128xf32>
    %154 = arith.mulf %153, %102 : vector<1x128xf32>
    %155 = arith.addf %152, %154 : vector<1x128xf32>
    %156 = vector.broadcast %15 : f32 to vector<1x128xf32>
    %157 = arith.mulf %156, %105 : vector<1x128xf32>
    %158 = arith.addf %155, %157 : vector<1x128xf32>
    %159 = vector.broadcast %21 : f32 to vector<1x128xf32>
    %160 = arith.mulf %159, %108 : vector<1x128xf32>
    %161 = arith.addf %158, %160 : vector<1x128xf32>
    %162 = vector.broadcast %27 : f32 to vector<1x128xf32>
    %163 = arith.addf %161, %162 : vector<1x128xf32>
    %164 = math.tanh %163 : vector<1x128xf32>
    %165 = vector.broadcast %4 : f32 to vector<1x128xf32>
    %166 = arith.mulf %165, %99 : vector<1x128xf32>
    %167 = vector.broadcast %10 : f32 to vector<1x128xf32>
    %168 = arith.mulf %167, %102 : vector<1x128xf32>
    %169 = arith.addf %166, %168 : vector<1x128xf32>
    %170 = vector.broadcast %16 : f32 to vector<1x128xf32>
    %171 = arith.mulf %170, %105 : vector<1x128xf32>
    %172 = arith.addf %169, %171 : vector<1x128xf32>
    %173 = vector.broadcast %22 : f32 to vector<1x128xf32>
    %174 = arith.mulf %173, %108 : vector<1x128xf32>
    %175 = arith.addf %172, %174 : vector<1x128xf32>
    %176 = vector.broadcast %28 : f32 to vector<1x128xf32>
    %177 = arith.addf %175, %176 : vector<1x128xf32>
    %178 = math.tanh %177 : vector<1x128xf32>
    %179 = vector.broadcast %5 : f32 to vector<1x128xf32>
    %180 = arith.mulf %179, %99 : vector<1x128xf32>
    %181 = vector.broadcast %11 : f32 to vector<1x128xf32>
    %182 = arith.mulf %181, %102 : vector<1x128xf32>
    %183 = arith.addf %180, %182 : vector<1x128xf32>
    %184 = vector.broadcast %17 : f32 to vector<1x128xf32>
    %185 = arith.mulf %184, %105 : vector<1x128xf32>
    %186 = arith.addf %183, %185 : vector<1x128xf32>
    %187 = vector.broadcast %23 : f32 to vector<1x128xf32>
    %188 = arith.mulf %187, %108 : vector<1x128xf32>
    %189 = arith.addf %186, %188 : vector<1x128xf32>
    %190 = vector.broadcast %29 : f32 to vector<1x128xf32>
    %191 = arith.addf %189, %190 : vector<1x128xf32>
    %192 = math.tanh %191 : vector<1x128xf32>
    %193 = vector.broadcast %30 : f32 to vector<1x128xf32>
    %194 = arith.mulf %193, %122 : vector<1x128xf32>
    %195 = vector.broadcast %39 : f32 to vector<1x128xf32>
    %196 = arith.mulf %195, %136 : vector<1x128xf32>
    %197 = arith.addf %194, %196 : vector<1x128xf32>
    %198 = vector.broadcast %48 : f32 to vector<1x128xf32>
    %199 = arith.mulf %198, %150 : vector<1x128xf32>
    %200 = arith.addf %197, %199 : vector<1x128xf32>
    %201 = vector.broadcast %57 : f32 to vector<1x128xf32>
    %202 = arith.mulf %201, %164 : vector<1x128xf32>
    %203 = arith.addf %200, %202 : vector<1x128xf32>
    %204 = vector.broadcast %66 : f32 to vector<1x128xf32>
    %205 = arith.mulf %204, %178 : vector<1x128xf32>
    %206 = arith.addf %203, %205 : vector<1x128xf32>
    %207 = vector.broadcast %75 : f32 to vector<1x128xf32>
    %208 = arith.mulf %207, %192 : vector<1x128xf32>
    %209 = arith.addf %206, %208 : vector<1x128xf32>
    %210 = vector.broadcast %84 : f32 to vector<1x128xf32>
    %211 = arith.addf %209, %210 : vector<1x128xf32>
    %c0_172 = arith.constant 0 : index
    %212 = arith.index_cast %96 : i32 to index
    %c0_173 = arith.constant 0 : index
    %213 = vector.load %arg6[%c0_172, %212, %c0_173] : memref<9x1x128xf32, #tpu.memory_space<vmem>>, vector<1x1x128xf32>
    %214 = vector.shape_cast %213 : vector<1x1x128xf32> to vector<1x128xf32>
    %215 = vector.shape_cast %211 : vector<1x128xf32> to vector<1x1x128xf32>
    tpu.vector_store %arg6[%c0_172, %212, %c0_173], %215 {strides = array<i32>} : memref<9x1x128xf32, #tpu.memory_space<vmem>>, vector<1x1x128xf32>,
    %216 = vector.broadcast %31 : f32 to vector<1x128xf32>
    %217 = arith.mulf %216, %122 : vector<1x128xf32>
    %218 = vector.broadcast %40 : f32 to vector<1x128xf32>
    %219 = arith.mulf %218, %136 : vector<1x128xf32>
    %220 = arith.addf %217, %219 : vector<1x128xf32>
    %221 = vector.broadcast %49 : f32 to vector<1x128xf32>
    %222 = arith.mulf %221, %150 : vector<1x128xf32>
    %223 = arith.addf %220, %222 : vector<1x128xf32>
    %224 = vector.broadcast %58 : f32 to vector<1x128xf32>
    %225 = arith.mulf %224, %164 : vector<1x128xf32>
    %226 = arith.addf %223, %225 : vector<1x128xf32>
    %227 = vector.broadcast %67 : f32 to vector<1x128xf32>
    %228 = arith.mulf %227, %178 : vector<1x128xf32>
    %229 = arith.addf %226, %228 : vector<1x128xf32>
    %230 = vector.broadcast %76 : f32 to vector<1x128xf32>
    %231 = arith.mulf %230, %192 : vector<1x128xf32>
    %232 = arith.addf %229, %231 : vector<1x128xf32>
    %233 = vector.broadcast %85 : f32 to vector<1x128xf32>
    %234 = arith.addf %232, %233 : vector<1x128xf32>
    %c1_174 = arith.constant 1 : index
    %235 = arith.index_cast %96 : i32 to index
    %c0_175 = arith.constant 0 : index
    %236 = vector.load %arg6[%c1_174, %235, %c0_175] : memref<9x1x128xf32, #tpu.memory_space<vmem>>, vector<1x1x128xf32>
    %237 = vector.shape_cast %236 : vector<1x1x128xf32> to vector<1x128xf32>
    %238 = vector.shape_cast %234 : vector<1x128xf32> to vector<1x1x128xf32>
    tpu.vector_store %arg6[%c1_174, %235, %c0_175], %238 {strides = array<i32>} : memref<9x1x128xf32, #tpu.memory_space<vmem>>, vector<1x1x128xf32>,
    %239 = vector.broadcast %32 : f32 to vector<1x128xf32>
    %240 = arith.mulf %239, %122 : vector<1x128xf32>
    %241 = vector.broadcast %41 : f32 to vector<1x128xf32>
    %242 = arith.mulf %241, %136 : vector<1x128xf32>
    %243 = arith.addf %240, %242 : vector<1x128xf32>
    %244 = vector.broadcast %50 : f32 to vector<1x128xf32>
    %245 = arith.mulf %244, %150 : vector<1x128xf32>
    %246 = arith.addf %243, %245 : vector<1x128xf32>
    %247 = vector.broadcast %59 : f32 to vector<1x128xf32>
    %248 = arith.mulf %247, %164 : vector<1x128xf32>
    %249 = arith.addf %246, %248 : vector<1x128xf32>
    %250 = vector.broadcast %68 : f32 to vector<1x128xf32>
    %251 = arith.mulf %250, %178 : vector<1x128xf32>
    %252 = arith.addf %249, %251 : vector<1x128xf32>
    %253 = vector.broadcast %77 : f32 to vector<1x128xf32>
    %254 = arith.mulf %253, %192 : vector<1x128xf32>
    %255 = arith.addf %252, %254 : vector<1x128xf32>
    %256 = vector.broadcast %86 : f32 to vector<1x128xf32>
    %257 = arith.addf %255, %256 : vector<1x128xf32>
    %c2_176 = arith.constant 2 : index
    %258 = arith.index_cast %96 : i32 to index
    %c0_177 = arith.constant 0 : index
    %259 = vector.load %arg6[%c2_176, %258, %c0_177] : memref<9x1x128xf32, #tpu.memory_space<vmem>>, vector<1x1x128xf32>
    %260 = vector.shape_cast %259 : vector<1x1x128xf32> to vector<1x128xf32>
    %261 = vector.shape_cast %257 : vector<1x128xf32> to vector<1x1x128xf32>
    tpu.vector_store %arg6[%c2_176, %258, %c0_177], %261 {strides = array<i32>} : memref<9x1x128xf32, #tpu.memory_space<vmem>>, vector<1x1x128xf32>,
    %262 = vector.broadcast %33 : f32 to vector<1x128xf32>
    %263 = arith.mulf %262, %122 : vector<1x128xf32>
    %264 = vector.broadcast %42 : f32 to vector<1x128xf32>
    %265 = arith.mulf %264, %136 : vector<1x128xf32>
    %266 = arith.addf %263, %265 : vector<1x128xf32>
    %267 = vector.broadcast %51 : f32 to vector<1x128xf32>
    %268 = arith.mulf %267, %150 : vector<1x128xf32>
    %269 = arith.addf %266, %268 : vector<1x128xf32>
    %270 = vector.broadcast %60 : f32 to vector<1x128xf32>
    %271 = arith.mulf %270, %164 : vector<1x128xf32>
    %272 = arith.addf %269, %271 : vector<1x128xf32>
    %273 = vector.broadcast %69 : f32 to vector<1x128xf32>
    %274 = arith.mulf %273, %178 : vector<1x128xf32>
    %275 = arith.addf %272, %274 : vector<1x128xf32>
    %276 = vector.broadcast %78 : f32 to vector<1x128xf32>
    %277 = arith.mulf %276, %192 : vector<1x128xf32>
    %278 = arith.addf %275, %277 : vector<1x128xf32>
    %279 = vector.broadcast %87 : f32 to vector<1x128xf32>
    %280 = arith.addf %278, %279 : vector<1x128xf32>
    %c3_178 = arith.constant 3 : index
    %281 = arith.index_cast %96 : i32 to index
    %c0_179 = arith.constant 0 : index
    %282 = vector.load %arg6[%c3_178, %281, %c0_179] : memref<9x1x128xf32, #tpu.memory_space<vmem>>, vector<1x1x128xf32>
    %283 = vector.shape_cast %282 : vector<1x1x128xf32> to vector<1x128xf32>
    %284 = vector.shape_cast %280 : vector<1x128xf32> to vector<1x1x128xf32>
    tpu.vector_store %arg6[%c3_178, %281, %c0_179], %284 {strides = array<i32>} : memref<9x1x128xf32, #tpu.memory_space<vmem>>, vector<1x1x128xf32>,
    %285 = vector.broadcast %34 : f32 to vector<1x128xf32>
    %286 = arith.mulf %285, %122 : vector<1x128xf32>
    %287 = vector.broadcast %43 : f32 to vector<1x128xf32>
    %288 = arith.mulf %287, %136 : vector<1x128xf32>
    %289 = arith.addf %286, %288 : vector<1x128xf32>
    %290 = vector.broadcast %52 : f32 to vector<1x128xf32>
    %291 = arith.mulf %290, %150 : vector<1x128xf32>
    %292 = arith.addf %289, %291 : vector<1x128xf32>
    %293 = vector.broadcast %61 : f32 to vector<1x128xf32>
    %294 = arith.mulf %293, %164 : vector<1x128xf32>
    %295 = arith.addf %292, %294 : vector<1x128xf32>
    %296 = vector.broadcast %70 : f32 to vector<1x128xf32>
    %297 = arith.mulf %296, %178 : vector<1x128xf32>
    %298 = arith.addf %295, %297 : vector<1x128xf32>
    %299 = vector.broadcast %79 : f32 to vector<1x128xf32>
    %300 = arith.mulf %299, %192 : vector<1x128xf32>
    %301 = arith.addf %298, %300 : vector<1x128xf32>
    %302 = vector.broadcast %88 : f32 to vector<1x128xf32>
    %303 = arith.addf %301, %302 : vector<1x128xf32>
    %c4_180 = arith.constant 4 : index
    %304 = arith.index_cast %96 : i32 to index
    %c0_181 = arith.constant 0 : index
    %305 = vector.load %arg6[%c4_180, %304, %c0_181] : memref<9x1x128xf32, #tpu.memory_space<vmem>>, vector<1x1x128xf32>
    %306 = vector.shape_cast %305 : vector<1x1x128xf32> to vector<1x128xf32>
    %307 = vector.shape_cast %303 : vector<1x128xf32> to vector<1x1x128xf32>
    tpu.vector_store %arg6[%c4_180, %304, %c0_181], %307 {strides = array<i32>} : memref<9x1x128xf32, #tpu.memory_space<vmem>>, vector<1x1x128xf32>,
    %308 = vector.broadcast %35 : f32 to vector<1x128xf32>
    %309 = arith.mulf %308, %122 : vector<1x128xf32>
    %310 = vector.broadcast %44 : f32 to vector<1x128xf32>
    %311 = arith.mulf %310, %136 : vector<1x128xf32>
    %312 = arith.addf %309, %311 : vector<1x128xf32>
    %313 = vector.broadcast %53 : f32 to vector<1x128xf32>
    %314 = arith.mulf %313, %150 : vector<1x128xf32>
    %315 = arith.addf %312, %314 : vector<1x128xf32>
    %316 = vector.broadcast %62 : f32 to vector<1x128xf32>
    %317 = arith.mulf %316, %164 : vector<1x128xf32>
    %318 = arith.addf %315, %317 : vector<1x128xf32>
    %319 = vector.broadcast %71 : f32 to vector<1x128xf32>
    %320 = arith.mulf %319, %178 : vector<1x128xf32>
    %321 = arith.addf %318, %320 : vector<1x128xf32>
    %322 = vector.broadcast %80 : f32 to vector<1x128xf32>
    %323 = arith.mulf %322, %192 : vector<1x128xf32>
    %324 = arith.addf %321, %323 : vector<1x128xf32>
    %325 = vector.broadcast %89 : f32 to vector<1x128xf32>
    %326 = arith.addf %324, %325 : vector<1x128xf32>
    %c5_182 = arith.constant 5 : index
    %327 = arith.index_cast %96 : i32 to index
    %c0_183 = arith.constant 0 : index
    %328 = vector.load %arg6[%c5_182, %327, %c0_183] : memref<9x1x128xf32, #tpu.memory_space<vmem>>, vector<1x1x128xf32>
    %329 = vector.shape_cast %328 : vector<1x1x128xf32> to vector<1x128xf32>
    %330 = vector.shape_cast %326 : vector<1x128xf32> to vector<1x1x128xf32>
    tpu.vector_store %arg6[%c5_182, %327, %c0_183], %330 {strides = array<i32>} : memref<9x1x128xf32, #tpu.memory_space<vmem>>, vector<1x1x128xf32>,
    %331 = vector.broadcast %36 : f32 to vector<1x128xf32>
    %332 = arith.mulf %331, %122 : vector<1x128xf32>
    %333 = vector.broadcast %45 : f32 to vector<1x128xf32>
    %334 = arith.mulf %333, %136 : vector<1x128xf32>
    %335 = arith.addf %332, %334 : vector<1x128xf32>
    %336 = vector.broadcast %54 : f32 to vector<1x128xf32>
    %337 = arith.mulf %336, %150 : vector<1x128xf32>
    %338 = arith.addf %335, %337 : vector<1x128xf32>
    %339 = vector.broadcast %63 : f32 to vector<1x128xf32>
    %340 = arith.mulf %339, %164 : vector<1x128xf32>
    %341 = arith.addf %338, %340 : vector<1x128xf32>
    %342 = vector.broadcast %72 : f32 to vector<1x128xf32>
    %343 = arith.mulf %342, %178 : vector<1x128xf32>
    %344 = arith.addf %341, %343 : vector<1x128xf32>
    %345 = vector.broadcast %81 : f32 to vector<1x128xf32>
    %346 = arith.mulf %345, %192 : vector<1x128xf32>
    %347 = arith.addf %344, %346 : vector<1x128xf32>
    %348 = vector.broadcast %90 : f32 to vector<1x128xf32>
    %349 = arith.addf %347, %348 : vector<1x128xf32>
    %c6_184 = arith.constant 6 : index
    %350 = arith.index_cast %96 : i32 to index
    %c0_185 = arith.constant 0 : index
    %351 = vector.load %arg6[%c6_184, %350, %c0_185] : memref<9x1x128xf32, #tpu.memory_space<vmem>>, vector<1x1x128xf32>
    %352 = vector.shape_cast %351 : vector<1x1x128xf32> to vector<1x128xf32>
    %353 = vector.shape_cast %349 : vector<1x128xf32> to vector<1x1x128xf32>
    tpu.vector_store %arg6[%c6_184, %350, %c0_185], %353 {strides = array<i32>} : memref<9x1x128xf32, #tpu.memory_space<vmem>>, vector<1x1x128xf32>,
    %354 = vector.broadcast %37 : f32 to vector<1x128xf32>
    %355 = arith.mulf %354, %122 : vector<1x128xf32>
    %356 = vector.broadcast %46 : f32 to vector<1x128xf32>
    %357 = arith.mulf %356, %136 : vector<1x128xf32>
    %358 = arith.addf %355, %357 : vector<1x128xf32>
    %359 = vector.broadcast %55 : f32 to vector<1x128xf32>
    %360 = arith.mulf %359, %150 : vector<1x128xf32>
    %361 = arith.addf %358, %360 : vector<1x128xf32>
    %362 = vector.broadcast %64 : f32 to vector<1x128xf32>
    %363 = arith.mulf %362, %164 : vector<1x128xf32>
    %364 = arith.addf %361, %363 : vector<1x128xf32>
    %365 = vector.broadcast %73 : f32 to vector<1x128xf32>
    %366 = arith.mulf %365, %178 : vector<1x128xf32>
    %367 = arith.addf %364, %366 : vector<1x128xf32>
    %368 = vector.broadcast %82 : f32 to vector<1x128xf32>
    %369 = arith.mulf %368, %192 : vector<1x128xf32>
    %370 = arith.addf %367, %369 : vector<1x128xf32>
    %371 = vector.broadcast %91 : f32 to vector<1x128xf32>
    %372 = arith.addf %370, %371 : vector<1x128xf32>
    %c7_186 = arith.constant 7 : index
    %373 = arith.index_cast %96 : i32 to index
    %c0_187 = arith.constant 0 : index
    %374 = vector.load %arg6[%c7_186, %373, %c0_187] : memref<9x1x128xf32, #tpu.memory_space<vmem>>, vector<1x1x128xf32>
    %375 = vector.shape_cast %374 : vector<1x1x128xf32> to vector<1x128xf32>
    %376 = vector.shape_cast %372 : vector<1x128xf32> to vector<1x1x128xf32>
    tpu.vector_store %arg6[%c7_186, %373, %c0_187], %376 {strides = array<i32>} : memref<9x1x128xf32, #tpu.memory_space<vmem>>, vector<1x1x128xf32>,
    %377 = vector.broadcast %38 : f32 to vector<1x128xf32>
    %378 = arith.mulf %377, %122 : vector<1x128xf32>
    %379 = vector.broadcast %47 : f32 to vector<1x128xf32>
    %380 = arith.mulf %379, %136 : vector<1x128xf32>
    %381 = arith.addf %378, %380 : vector<1x128xf32>
    %382 = vector.broadcast %56 : f32 to vector<1x128xf32>
    %383 = arith.mulf %382, %150 : vector<1x128xf32>
    %384 = arith.addf %381, %383 : vector<1x128xf32>
    %385 = vector.broadcast %65 : f32 to vector<1x128xf32>
    %386 = arith.mulf %385, %164 : vector<1x128xf32>
    %387 = arith.addf %384, %386 : vector<1x128xf32>
    %388 = vector.broadcast %74 : f32 to vector<1x128xf32>
    %389 = arith.mulf %388, %178 : vector<1x128xf32>
    %390 = arith.addf %387, %389 : vector<1x128xf32>
    %391 = vector.broadcast %83 : f32 to vector<1x128xf32>
    %392 = arith.mulf %391, %192 : vector<1x128xf32>
    %393 = arith.addf %390, %392 : vector<1x128xf32>
    %394 = vector.broadcast %92 : f32 to vector<1x128xf32>
    %395 = arith.addf %393, %394 : vector<1x128xf32>
    %c8_188 = arith.constant 8 : index
    %396 = arith.index_cast %96 : i32 to index
    %c0_189 = arith.constant 0 : index
    %397 = vector.load %arg6[%c8_188, %396, %c0_189] : memref<9x1x128xf32, #tpu.memory_space<vmem>>, vector<1x1x128xf32>
    %398 = vector.shape_cast %397 : vector<1x1x128xf32> to vector<1x128xf32>
    %399 = vector.shape_cast %395 : vector<1x128xf32> to vector<1x1x128xf32>
    tpu.vector_store %arg6[%c8_188, %396, %c0_189], %399 {strides = array<i32>} : memref<9x1x128xf32, #tpu.memory_space<vmem>>, vector<1x1x128xf32>,
    %c1_i32_190 = arith.constant 1 : i32
    return
  }
  func.func @transform_0(%arg0: i32) -> (i32, i32, i32) {
    %c0_i32 = arith.constant 0 : i32
    %c0_i32_0 = arith.constant 0 : i32
    %c0_i32_1 = arith.constant 0 : i32
    return %c0_i32, %arg0, %c0_i32_0 : i32, i32, i32
  }
  func.func @transform_1(%arg0: i32) -> (i32, i32) {
    %c0_i32 = arith.constant 0 : i32
    %c0_i32_0 = arith.constant 0 : i32
    %c0_i32_1 = arith.constant 0 : i32
    return %c0_i32, %c0_i32_0 : i32, i32
  }
  func.func @transform_2(%arg0: i32) -> i32 {
    %c0_i32 = arith.constant 0 : i32
    %c0_i32_0 = arith.constant 0 : i32
    return %c0_i32 : i32
  }
  func.func @transform_3(%arg0: i32) -> (i32, i32) {
    %c0_i32 = arith.constant 0 : i32
    %c0_i32_0 = arith.constant 0 : i32
    %c0_i32_1 = arith.constant 0 : i32
    return %c0_i32, %c0_i32_0 : i32, i32
  }
  func.func @transform_4(%arg0: i32) -> i32 {
    %c0_i32 = arith.constant 0 : i32
    %c0_i32_0 = arith.constant 0 : i32
    return %c0_i32 : i32
  }
  func.func @transform_5(%arg0: i32) -> (i32, i32, i32) {
    %c0_i32 = arith.constant 0 : i32
    %c0_i32_0 = arith.constant 0 : i32
    %c0_i32_1 = arith.constant 0 : i32
    return %c0_i32, %arg0, %c0_i32_0 : i32, i32, i32
  }
}

</mosaic_0001>

<bundles_post_ra>
// kernel: tpu_custom_call.1
= control target key start
LH: loop header
LB: loop body
LE: loop exit
PB: predicated region body
PF: predicated region fallthrough
CT: control target
= control target key end

     0   :  { %10 = vsyncpa [#allocation3], 0  ;;  %s1158_s0 = inlined_call_operand.hbm [shape: f32[4,1,128], index: 0, kind: input, shape index: {}]   ;;  %s1159_s1 = inlined_call_operand.hbm [shape: f32[4,6], index: 1, kind: input, shape index: {}]   ;;  %s1160_s2 = inlined_call_operand.vmem [shape: f32[6], index: 2, kind: input, shape index: {}]   ;;  %s1161_s3 = inlined_call_operand.vmem [shape: f32[6,9], index: 3, kind: input, shape index: {}]   ;;  %s1162_s4 = inlined_call_operand.vmem [shape: f32[9], index: 4, kind: input, shape index: {}]   ;;  %s1163_s5 = inlined_call_operand.hbm [shape: f32[9,1,128], index: 5, kind: output, shape index: {}]  }
   0x1   :  { %11 = vsyncpa [#allocation5], 0 }
   0x2   :  { %12 = vsyncpa [#allocation6], 0 }
   0x3   :  { %13 = vsyncpa [#allocation10], 0  ;;  %s51_s20 = sshll.u32 %s1161_s3, 4  ;;  %s52_s20 = int_to_ptr.vmem [resolvable:$true] %s51_s20 }
   0x4   :  { %14 = vsyncpa [#allocation4], 0  ;;  %s601_s21 = scalar_lea.vmem %s52_s20, 128  ;;  %p606_p1 = scmp.lt.s32.totalorder %s52_s20, %s52_s20 }
   0x5   :  { %p602_p0 = scmp.ne.s32.totalorder %s52_s20, %s601_s21  ;;  %p607_p2 = scmp.lt.s32.totalorder %s601_s21, %s601_s21 }
   0x7   :  { %p608_p3 = por %p607_p2, %p606_p1 }
   0x9   :  { %p609_p4 = pnand %p608_p3, %p602_p0 }
   0xb   :  { %612 = shalt.err (!%p609_p4)
}
   0xc   :  { %s701_s22 = smov [#allocation9]   ;;  %s702_s23 = smov [#allocation2]  }
   0xd   :  { %54 = dma.vmem_to_smem %s52_s20, 128, %s701_s22, [#allocation10]  }
   0xe   :  { %s20_s24 = sshll.u32 %s702_s23, 4  ;;  %s613_s27 = scalar_lea.hbm %s1158_s0, 64  ;;  %s21_s24 = int_to_ptr.vmem [resolvable:$true] %s20_s24 }
   0xf   :  { %p614_p5 = scmp.ne.s32.totalorder %s1158_s0, %s613_s27  ;;  %p617_p6 = scmp.lt.u32.totalorder %s613_s27, %s1158_s0 }
  0x11   :  { %p619_p7 = pnand %p617_p6, %p614_p5 }
  0x13   :  { %622 = shalt.err (!%p619_p7)
}
  0x14   :  { %s623_s6 = scalar_lea.vmem %s21_s24, 64  ;;  %p628_p9 = scmp.lt.s32.totalorder %s21_s24, %s21_s24 }
  0x15   :  { %p624_p8 = scmp.ne.s32.totalorder %s21_s24, %s623_s6  ;;  %p629_p10 = scmp.lt.s32.totalorder %s623_s6, %s623_s6 }
  0x17   :  { %p630_p11 = por %p629_p10, %p628_p9 }
  0x19   :  { %p631_p12 = pnand %p630_p11, %p624_p8 }
  0x1b   :  { %634 = shalt.err (!%p631_p12)
}
  0x1c   :  { %s703_s7 = smov 16   ;;  %s704_s8 = smov 1  }
  0x1d   :  { %26 = dma.hbm_to_vmem [thread:$0]  %s1158_s0, 64, %s21_s24, [#allocation3], %s703_s7, %s703_s7, %s704_s8  }
  0x1e   :  { %s41_s13 = sshll.u32 %s1160_s2, 4  ;;  %s635_s16 = scalar_lea.hbm %s1159_s1, 64  ;;  %s42_s13 = int_to_ptr.vmem [resolvable:$true] %s41_s13 }
  0x1f   :  { %p636_p13 = scmp.ne.s32.totalorder %s1159_s1, %s635_s16  ;;  %p639_p0 = scmp.lt.u32.totalorder %s635_s16, %s1159_s1 }
  0x21   :  { %p641_p1 = pnand %p639_p0, %p636_p13 }
  0x23   :  { %644 = shalt.err (!%p641_p1)
}
  0x24   :  { %s705_s21 = smov [#allocation7]   ;;  %s645_s2 = scalar_lea.vmem %s42_s13, 16 }
  0x25   :  { %34 = dma.hbm_to_smem %s1159_s1, 64, %s705_s21, [#allocation5]  }
  0x26   :  { %p646_p2 = scmp.ne.s32.totalorder %s42_s13, %s645_s2  ;;  %p650_p3 = scmp.lt.s32.totalorder %s42_s13, %s42_s13 }
  0x27   :  { %p651_p4 = scmp.lt.s32.totalorder %s645_s2, %s645_s2 }
  0x29   :  { %p652_p5 = por %p651_p4, %p650_p3 }
  0x2b   :  { %p653_p6 = pnand %p652_p5, %p646_p2 }
  0x2d   :  { %656 = shalt.err (!%p653_p6)
}
  0x2e   :  { %s706_s23 = smov [#allocation8]   ;;  %s61_s26 = sshll.u32 %s1162_s4, 4  ;;  %s62_s26 = int_to_ptr.vmem [resolvable:$true] %s61_s26 }
  0x2f   :  { %44 = dma.vmem_to_smem %s42_s13, 16, %s706_s23, [#allocation6]  }
  0x30   :  { %s657_s27 = scalar_lea.vmem %s62_s26, 16  ;;  %p662_p8 = scmp.lt.s32.totalorder %s62_s26, %s62_s26 }
  0x31   :  { %p658_p7 = scmp.ne.s32.totalorder %s62_s26, %s657_s27  ;;  %p663_p9 = scmp.lt.s32.totalorder %s657_s27, %s657_s27 }
  0x33   :  { %p664_p10 = por %p663_p9, %p662_p8 }
  0x35   :  { %p665_p11 = pnand %p664_p10, %p658_p7 }
  0x37   :  { %668 = shalt.err (!%p665_p11)
}
  0x38   :  { %s707_s1 = smov [#allocation11]  }
  0x39   :  { %64 = dma.vmem_to_smem %s62_s26, 16, %s707_s1, [#allocation10]  }
  0x3a   :  { %691 = dma.done.wait [#allocation3], 64  }
  0x3b   :  { %692 = vsyncadd [#allocation3], 4294967232 }
  0x3c   :  { %693 = dma.done.wait [#allocation5], 64  }
  0x3d   :  { %694 = vsyncadd [#allocation5], 4294967232 }
  0x3e   :  { %695 = dma.done.wait [#allocation6], 16  }
  0x3f   :  { %696 = vsyncadd [#allocation6], 4294967280 }
  0x40   :  { %697 = dma.done.wait [#allocation10], 144  }
  0x41   :  { %698 = vsyncadd [#allocation10], 4294967152 }
  0x42   :  { %80 = sfence }
  0x43   :  { %s81_s4 = sld [smem:[#allocation7]]  ;;  %s492_s28 = sld [smem:[#allocation7 + $0x1]]  ;;  %v174_v0 = vld [vmem:[#allocation2] sm:$0x1]  ;;  %v797_v3 = vld [vmem:[#allocation2 + $0x1] sm:$0x1] }
  0x44   :  { %s493_s3 = sld [smem:[#allocation7 + $0x2]]  ;;  %s494_s29 = sld [smem:[#allocation7 + $0x3]]  ;;  %v816_v16 = vld [vmem:[#allocation2 + $0x2] sm:$0x1]  ;;  %v840_v29 = vld [vmem:[#allocation2 + $0x3] sm:$0x1] }
  0x45   :  { %s775_s30 = sld [smem:[#allocation7 + $0x4]]  ;;  %s496_s6 = sld [smem:[#allocation7 + $0x5]] }
  0x46   :  { %s777_s9 = sld [smem:[#allocation7 + $0x80]]  ;;  %s779_s10 = sld [smem:[#allocation7 + $0x81]] }
  0x47   :  { %s781_s11 = sld [smem:[#allocation7 + $0x82]]  ;;  %s783_s12 = sld [smem:[#allocation7 + $0x83]] }
  0x48   :  { %s785_s13 = sld [smem:[#allocation7 + $0x84]]  ;;  %s787_s14 = sld [smem:[#allocation7 + $0x85]] }
  0x49   :  { %s789_s15 = sld [smem:[#allocation7 + $0x100]]  ;;  %s791_s16 = sld [smem:[#allocation7 + $0x101]]  ;;  %v184_v1 = vstv %s81_s4  ;;  %v198_v2 = vstv %s492_s28 }
  0x4a   :  { %s793_s17 = sld [smem:[#allocation7 + $0x102]]  ;;  %s795_s18 = sld [smem:[#allocation7 + $0x103]]  ;;  %v185_v4 = vmul.f32 %v184_v1, %v174_v0  ;;  %v199_v5 = vmul.f32 %v198_v2, %v174_v0  ;;  %v212_v6 = vstv %s493_s3  ;;  %v226_v7 = vstv %s494_s29 }
  0x4b   :  { %s799_s19 = sld [smem:[#allocation7 + $0x104]]  ;;  %s801_s20 = sld [smem:[#allocation7 + $0x105]]  ;;  %v213_v8 = vmul.f32 %v212_v6, %v174_v0  ;;  %v227_v9 = vmul.f32 %v226_v7, %v174_v0  ;;  %v240_v10 = vstv %s775_s30  ;;  %v254_v11 = vstv %s496_s6 }
  0x4c   :  { %s804_s21 = sld [smem:[#allocation7 + $0x180]]  ;;  %s806_s0 = sld [smem:[#allocation7 + $0x181]]  ;;  %v186_v12 = vstv %s777_s9  ;;  %v200_v13 = vstv %s779_s10  ;;  %v241_v14 = vmul.f32 %v240_v10, %v174_v0  ;;  %v810_v15 = vmul.f32 %v254_v11, %v174_v0 }
  0x4d   :  { %s812_s22 = sld [smem:[#allocation7 + $0x182]]  ;;  %s814_s2 = sld [smem:[#allocation7 + $0x183]]  ;;  %v187_v17 = vmul.f32 %v186_v12, %v797_v3  ;;  %v201_v18 = vmul.f32 %v200_v13, %v797_v3  ;;  %v214_v19 = vstv %s781_s11  ;;  %v228_v20 = vstv %s783_s12 }
  0x4e   :  { %s822_s23 = sld [smem:[#allocation7 + $0x184]]  ;;  %s824_s24 = sld [smem:[#allocation7 + $0x185]]  ;;  %v215_v21 = vmul.f32 %v214_v19, %v797_v3  ;;  %v229_v22 = vmul.f32 %v228_v20, %v797_v3  ;;  %v242_v23 = vstv %s785_s13  ;;  %v256_v24 = vstv %s787_s14 }
  0x4f   :  { %s830_s25 = sld [smem:[#allocation8]]  ;;  %s832_s26 = sld [smem:[#allocation8 + $0x1]]  ;;  %v188_v25 = vadd.f32 %v187_v17, %v185_v4  ;;  %v189_v26 = vstv %s789_s15  ;;  %v202_v27 = vadd.f32 %v201_v18, %v199_v5  ;;  %v203_v28 = vstv %s791_s16 }
  0x50   :  { %s836_s27 = sld [smem:[#allocation8 + $0x2]]  ;;  %s838_s1 = sld [smem:[#allocation8 + $0x3]]  ;;  %v190_v30 = vmul.f32 %v189_v26, %v816_v16  ;;  %v204_v31 = vmul.f32 %v203_v28, %v816_v16  ;;  %v216_v32 = vadd.f32 %v215_v21, %v213_v8  ;;  %v217_v33 = vstv %s793_s17 }
  0x51   :  { %s845_s4 = sld [smem:[#allocation8 + $0x4]]  ;;  %s847_s28 = sld [smem:[#allocation8 + $0x5]]  ;;  %v218_v34 = vmul.f32 %v217_v33, %v816_v16  ;;  %v230_v35 = vadd.f32 %v229_v22, %v227_v9  ;;  %v231_v36 = vstv %s795_s18  ;;  %v243_v37 = vmul.f32 %v242_v23, %v797_v3 }
  0x52   :  { %s852_s3 = sld [smem:[#allocation9]]  ;;  %v191_v38 = vadd.f32 %v190_v30, %v188_v25  ;;  %v192_v39 = vstv %s804_s21  ;;  %v205_v40 = vadd.f32 %v204_v31, %v202_v27  ;;  %v206_v41 = vstv %s806_s0  ;;  %s876_s12 = sld [smem:[#allocation9 + $0x1]] }
  0x53   :  { %s854_s29 = sld [smem:[#allocation9 + $0x80]]  ;;  %v193_v42 = vmul.f32 %v192_v39, %v840_v29  ;;  %v207_v43 = vmul.f32 %v206_v41, %v840_v29  ;;  %v219_v44 = vadd.f32 %v218_v34, %v216_v32  ;;  %v220_v45 = vstv %s812_s22  ;;  %s880_s13 = sld [smem:[#allocation9 + $0x81]] }
  0x54   :  { %s858_s30 = sld [smem:[#allocation9 + $0x100]]  ;;  %v221_v46 = vmul.f32 %v220_v45, %v840_v29  ;;  %v232_v47 = vmul.f32 %v231_v36, %v816_v16  ;;  %v234_v48 = vstv %s814_s2  ;;  %v244_v49 = vadd.f32 %v243_v37, %v241_v14  ;;  %s882_s15 = sld [smem:[#allocation9 + $0x101]] }
  0x55   :  { %s860_s6 = sld [smem:[#allocation9 + $0x180]]  ;;  %v194_v50 = vadd.f32 %v193_v42, %v191_v38  ;;  %v195_v51 = vstv %s830_s25  ;;  %v208_v52 = vadd.f32 %v207_v43, %v205_v40  ;;  %v209_v53 = vstv %s832_s26  ;;  %s886_s16 = sld [smem:[#allocation9 + $0x181]] }
  0x56   :  { %s865_s9 = sld [smem:[#allocation9 + $0x200]]  ;;  %v222_v54 = vadd.f32 %v221_v46, %v219_v44  ;;  %v223_v55 = vstv %s836_s27  ;;  %v233_v56 = vadd.f32 %v232_v47, %v230_v35  ;;  %v235_v57 = vmul.f32 %v234_v48, %v840_v29  ;;  %s888_s17 = sld [smem:[#allocation9 + $0x201]] }
  0x57   :  { %s867_s10 = sld [smem:[#allocation9 + $0x280]]  ;;  %v196_v58 = vadd.f32 %v195_v51, %v194_v50  ;;  %v210_v59 = vadd.f32 %v209_v53, %v208_v52  ;;  %v237_v60 = vstv %s838_s1  ;;  %v245_v61 = vstv %s799_s19  ;;  %s892_s18 = sld [smem:[#allocation9 + $0x281]] }
  0x58   :  { %s872_s11 = sld [smem:[#allocation11]]  ;;  %v224_v62 = vadd.f32 %v223_v55, %v222_v54  ;;  %v236_v63 = vadd.f32 %v235_v57, %v233_v56  ;;  %v246_v0 = vmul.f32 %v245_v61, %v816_v16  ;;  %v248_v1 = vstv %s822_s23  ;;  %s894_s21 = sld [smem:[#allocation11 + $0x1]] }
  0x59   :  { %589 = vtanh.f32 %v196_v58  ;;  %v249_v2 = vmul.f32 %v248_v1, %v840_v29  ;;  %v251_v4 = vstv %s845_s4  ;;  %v257_v5 = vmul.f32 %v256_v24, %v797_v3  ;;  %s901_s19 = sld [smem:[#allocation9 + $0x2]]  ;;  %s921_s25 = sld [smem:[#allocation9 + $0x3]] }
  0x5a   :  { %s903_s0 = sld [smem:[#allocation9 + $0x82]]  ;;  %591 = vtanh.f32 %v210_v59  ;;  %v238_v6 = vadd.f32 %v237_v60, %v236_v63  ;;  %v247_v7 = vadd.f32 %v246_v0, %v244_v49  ;;  %v259_v8 = vstv %s801_s20  ;;  %s937_s26 = sld [smem:[#allocation9 + $0x103]] }
  0x5b   :  { %s906_s22 = sld [smem:[#allocation9 + $0x102]]  ;;  %593 = vtanh.f32 %v224_v62  ;;  %v258_v9 = vadd.f32 %v257_v5, %v810_v15  ;;  %v260_v3 = vmul.f32 %v259_v8, %v816_v16  ;;  %v262_v10 = vstv %s824_s24  ;;  %s926_s24 = sld [smem:[#allocation9 + $0x83]] }
  0x5c   :  { %s908_s2 = sld [smem:[#allocation9 + $0x182]]  ;;  %595 = vtanh.f32 %v238_v6  ;;  %v250_v11 = vadd.f32 %v249_v2, %v247_v7  ;;  %v263_v12 = vmul.f32 %v262_v10, %v840_v29  ;;  %v265_v13 = vstv %s847_s28  ;;  %s942_s27 = sld [smem:[#allocation9 + $0x183]] }
  0x5d   :  { %s913_s14 = sld [smem:[#allocation9 + $0x202]]  ;;  %v261_v14 = vadd.f32 %v260_v3, %v258_v9  ;;  %v268_v15 = vstv %s852_s3  ;;  %v270_v16 = vstv %s854_s29  ;;  %v273_v17 = vstv %s858_s30  ;;  %s948_s1 = sld [smem:[#allocation9 + $0x203]] }
  0x5e   :  { %s915_s23 = sld [smem:[#allocation9 + $0x282]]  ;;  %v252_v18 = vadd.f32 %v251_v4, %v250_v11  ;;  %v276_v19 = vstv %s860_s6  ;;  %v279_v20 = vstv %s865_s9  ;;  %v282_v21 = vstv %s867_s10  ;;  %s950_s4 = sld [smem:[#allocation9 + $0x283]] }
  0x5f   :  { %s919_s20 = sld [smem:[#allocation11 + $0x2]]  ;;  %v264_v22 = vadd.f32 %v263_v12, %v261_v14  ;;  %v285_v23 = vstv %s872_s11  ;;  %v288_v24 = vstv %s876_s12  ;;  %v290_v25 = vstv %s880_s13  ;;  %s968_s28 = sld [smem:[#allocation11 + $0x3]] }
  0x60   :  { %597 = vtanh.f32 %v252_v18  ;;  %v293_v26 = vstv %s882_s15  ;;  %v296_v27 = vstv %s886_s16  ;;  %v299_v28 = vstv %s888_s17  ;;  %s971_s3 = sld [smem:[#allocation9 + $0x4]]  ;;  %s1006_s15 = sld [smem:[#allocation9 + $0x5]] }
  0x61   :  { %v266_v29 = vadd.f32 %v265_v13, %v264_v22  ;;  %v302_v30 = vstv %s892_s18  ;;  %v305_v31 = vstv %s894_s21  ;;  %v309_v32 = vstv %s901_s19  ;;  %s981_s29 = sld [smem:[#allocation9 + $0x84]]  ;;  %s1008_s16 = sld [smem:[#allocation9 + $0x85]] }
  0x62   :  { %v311_v33 = vstv %s903_s0  ;;  %v314_v34 = vstv %s906_s22  ;;  %v317_v35 = vstv %s908_s2  ;;  %v330_v40 = vstv %s921_s25  ;;  %s985_s30 = sld [smem:[#allocation9 + $0x104]]  ;;  %s1014_s9 = sld [smem:[#allocation9 + $0x105]] }
  0x63   :  { %v320_v36 = vstv %s913_s14  ;;  %v952_v37 = vpop.eup %589  ;;  %599 = vtanh.f32 %v266_v29  ;;  %v332_v50 = vstv %s926_s24  ;;  %v335_v63 = vstv %s937_s26  ;;  %s989_s6 = sld [smem:[#allocation9 + $0x184]]  ;;  %s1023_s17 = sld [smem:[#allocation9 + $0x185]] }
  0x64   :  { %v323_v38 = vstv %s915_s23  ;;  %v957_v41 = vpop.eup %591  ;;  %v269_v42 = vmul.f32 %v952_v37, %v268_v15  ;;  %v289_v43 = vmul.f32 %v952_v37, %v288_v24  ;;  %v310_v44 = vmul.f32 %v952_v37, %v309_v32  ;;  %s991_s12 = sld [smem:[#allocation9 + $0x204]]  ;;  %s1025_s19 = sld [smem:[#allocation9 + $0x205]] }
  0x65   :  { %v326_v39 = vstv %s919_s20  ;;  %v331_v45 = vmul.f32 %v952_v37, %v330_v40  ;;  %v963_v46 = vpop.eup %593  ;;  %v271_v47 = vmul.f32 %v957_v41, %v270_v16  ;;  %v291_v48 = vmul.f32 %v957_v41, %v290_v25  ;;  %s1002_s13 = sld [smem:[#allocation9 + $0x284]]  ;;  %s1033_s18 = sld [smem:[#allocation9 + $0x6]] }
  0x66   :  { %v312_v49 = vmul.f32 %v957_v41, %v311_v33  ;;  %v973_v51 = vpop.eup %595  ;;  %v274_v52 = vmul.f32 %v963_v46, %v273_v17  ;;  %v294_v53 = vmul.f32 %v963_v46, %v293_v26  ;;  %v315_v54 = vmul.f32 %v963_v46, %v314_v34  ;;  %s1028_s10 = sld [smem:[#allocation11 + $0x4]]  ;;  %s1038_s0 = sld [smem:[#allocation9 + $0x285]] }
  0x67   :  { %v333_v55 = vmul.f32 %v957_v41, %v332_v50  ;;  %v272_v56 = vadd.f32 %v271_v47, %v269_v42  ;;  %v277_v57 = vmul.f32 %v973_v51, %v276_v19  ;;  %v292_v58 = vadd.f32 %v291_v48, %v289_v43  ;;  %s1040_s22 = sld [smem:[#allocation9 + $0x86]]  ;;  %s1054_s23 = sld [smem:[#allocation11 + $0x5]] }
  0x68   :  { %v297_v59 = vmul.f32 %v973_v51, %v296_v27  ;;  %v313_v60 = vadd.f32 %v312_v49, %v310_v44  ;;  %v318_v61 = vmul.f32 %v973_v51, %v317_v35  ;;  %v336_v2 = vmul.f32 %v963_v46, %v335_v63  ;;  %s1048_s2 = sld [smem:[#allocation9 + $0x106]]  ;;  %s1065_s20 = sld [smem:[#allocation9 + $0x7]] }
  0x69   :  { %v334_v62 = vadd.f32 %v333_v55, %v331_v45  ;;  %v275_v0 = vadd.f32 %v274_v52, %v272_v56  ;;  %v295_v1 = vadd.f32 %v294_v53, %v292_v58  ;;  %v338_v4 = vstv %s942_s27  ;;  %s1050_s14 = sld [smem:[#allocation9 + $0x186]]  ;;  %s1071_s25 = sld [smem:[#allocation9 + $0x87]] }
  0x6a   :  { %v993_v5 = vpop.eup %597  ;;  %v316_v6 = vadd.f32 %v315_v54, %v313_v60  ;;  %v339_v7 = vmul.f32 %v973_v51, %v338_v4  ;;  %v341_v8 = vstv %s948_s1  ;;  %v344_v9 = vstv %s950_s4  ;;  %s1056_s11 = sld [smem:[#allocation9 + $0x206]]  ;;  %s1073_s24 = sld [smem:[#allocation9 + $0x107]] }
  0x6b   :  { %v278_v3 = vadd.f32 %v277_v57, %v275_v0  ;;  %v280_v10 = vmul.f32 %v993_v5, %v279_v20  ;;  %v298_v11 = vadd.f32 %v297_v59, %v295_v1  ;;  %v300_v12 = vmul.f32 %v993_v5, %v299_v28  ;;  %s1063_s21 = sld [smem:[#allocation9 + $0x286]]  ;;  %s1078_s26 = sld [smem:[#allocation9 + $0x187]] }
  0x6c   :  { %v319_v13 = vadd.f32 %v318_v61, %v316_v6  ;;  %v321_v14 = vmul.f32 %v993_v5, %v320_v36  ;;  %v337_v15 = vadd.f32 %v336_v2, %v334_v62  ;;  %v342_v16 = vmul.f32 %v993_v5, %v341_v8  ;;  %s1080_s27 = sld [smem:[#allocation9 + $0x207]]  ;;  %s1086_s1 = sld [smem:[#allocation11 + $0x6]] }
  0x6d   :  { %v1010_v17 = vpop.eup %599  ;;  %v281_v18 = vadd.f32 %v280_v10, %v278_v3  ;;  %v301_v19 = vadd.f32 %v300_v12, %v298_v11  ;;  %v347_v20 = vstv %s968_s28  ;;  %v351_v22 = vstv %s971_s3  ;;  %s1093_s4 = sld [smem:[#allocation9 + $0x287]]  ;;  %s1095_s28 = sld [smem:[#allocation9 + $0x8]] }
  0x6e   :  { %v283_v24 = vmul.f32 %v1010_v17, %v282_v21  ;;  %v303_v25 = vmul.f32 %v1010_v17, %v302_v30  ;;  %v322_v26 = vadd.f32 %v321_v14, %v319_v13  ;;  %v324_v27 = vmul.f32 %v1010_v17, %v323_v38  ;;  %s1100_s3 = sld [smem:[#allocation9 + $0x88]] }
  0x6f   :  { %v340_v28 = vadd.f32 %v339_v7, %v337_v15  ;;  %v345_v29 = vmul.f32 %v1010_v17, %v344_v9  ;;  %v352_v21 = vmul.f32 %v952_v37, %v351_v22  ;;  %v353_v30 = vstv %s981_s29  ;;  %s1102_s29 = sld [smem:[#allocation9 + $0x108]] }
  0x70   :  { %v284_v32 = vadd.f32 %v283_v24, %v281_v18  ;;  %v304_v33 = vadd.f32 %v303_v25, %v301_v19  ;;  %v325_v34 = vadd.f32 %v324_v27, %v322_v26  ;;  %v354_v35 = vmul.f32 %v957_v41, %v353_v30 }
  0x71   :  { %v343_v36 = vadd.f32 %v342_v16, %v340_v28  ;;  %v356_v38 = vstv %s985_s30  ;;  %v359_v40 = vstv %s989_s6  ;;  %v362_v42 = vstv %s991_s12  ;;  %s1106_s30 = sld [smem:[#allocation9 + $0x188]] }
  0x72   :  { %v286_v43 = vadd.f32 %v285_v23, %v284_v32  ;;  %v306_v44 = vadd.f32 %v305_v31, %v304_v33  ;;  %v327_v45 = vadd.f32 %v326_v39, %v325_v34  ;;  %v355_v47 = vadd.f32 %v354_v35, %v352_v21  ;;  %s1111_s6 = sld [smem:[#allocation9 + $0x208]] }
  0x73   :  { %v346_v48 = vadd.f32 %v345_v29, %v343_v36  ;;  %v357_v49 = vmul.f32 %v963_v46, %v356_v38  ;;  %v360_v50 = vmul.f32 %v973_v51, %v359_v40  ;;  %v365_v23 = vstv %s1002_s13  ;;  %s1119_s12 = sld [smem:[#allocation9 + $0x288]]  ;;  %s1122_s13 = sld [smem:[#allocation11 + $0x7]] }
  0x74   :  { %287 = vst [vmem:[#allocation12] sm:$0x1] %v286_v43  ;;  %308 = vst [vmem:[#allocation12 + $0x1] sm:$0x1] %v306_v44  ;;  %v373_v31 = vstv %s1006_s15  ;;  %v375_v39 = vstv %s1008_s16  ;;  %v363_v54 = vmul.f32 %v993_v5, %v362_v42  ;;  %v378_v57 = vstv %s1014_s9  ;;  %s580_s15 = sld [smem:[#allocation11 + $0x8]]  ;;  %s708_s16 = smov [#allocation12]  }
  0x75   :  { %329 = vst [vmem:[#allocation12 + $0x2] sm:$0x1] %v327_v45  ;;  %v348_v52 = vadd.f32 %v347_v20, %v346_v48  ;;  %v358_v53 = vadd.f32 %v357_v49, %v355_v47  ;;  %v374_v55 = vmul.f32 %v952_v37, %v373_v31  ;;  %v376_v56 = vmul.f32 %v957_v41, %v375_v39  ;;  %s466_s9 = sshll.u32 %s708_s16, 4  ;;  %s467_s9 = int_to_ptr.vmem [resolvable:$true] %s466_s9 }
  0x76   :  { %v381_v58 = vstv %s1023_s17  ;;  %v384_v59 = vstv %s1025_s19  ;;  %v366_v61 = vmul.f32 %v1010_v17, %v365_v23  ;;  %v368_v62 = vstv %s1028_s10  ;;  %s669_s17 = scalar_lea.vmem %s467_s9, 144  ;;  %s673_s19 = scalar_lea.vmem %s467_s9, 160 }
  0x77   :  { %350 = vst [vmem:[#allocation12 + $0x3] sm:$0x1] %v348_v52  ;;  %v361_v60 = vadd.f32 %v360_v50, %v358_v53  ;;  %v379_v63 = vmul.f32 %v963_v46, %v378_v57  ;;  %v377_v0 = vadd.f32 %v376_v56, %v374_v55  ;;  %v382_v1 = vmul.f32 %v973_v51, %v381_v58  ;;  %p670_p12 = scmp.ne.s32.totalorder %s467_s9, %s669_s17  ;;  %p674_p13 = scmp.lt.s32.totalorder %s467_s9, %s467_s9 }
  0x78   :  { %v385_v2 = vmul.f32 %v993_v5, %v384_v59  ;;  %v395_v4 = vstv %s1033_s18  ;;  %v387_v7 = vstv %s1038_s0  ;;  %v397_v9 = vstv %s1040_s22  ;;  %p675_p0 = scmp.lt.s32.totalorder %s673_s19, %s669_s17 }
  0x79   :  { %v364_v6 = vadd.f32 %v363_v54, %v361_v60  ;;  %v396_v8 = vmul.f32 %v952_v37, %v395_v4  ;;  %v380_v3 = vadd.f32 %v379_v63, %v377_v0  ;;  %v398_v10 = vmul.f32 %v957_v41, %v397_v9 }
  0x7a   :  { %v400_v11 = vstv %s1048_s2  ;;  %v403_v12 = vstv %s1050_s14  ;;  %v390_v14 = vstv %s1054_s23  ;;  %v406_v16 = vstv %s1056_s11  ;;  %p676_p1 = por %p675_p0, %p674_p13 }
  0x7b   :  { %v367_v13 = vadd.f32 %v366_v61, %v364_v6  ;;  %v401_v15 = vmul.f32 %v963_v46, %v400_v11  ;;  %v383_v18 = vadd.f32 %v382_v1, %v380_v3  ;;  %v388_v19 = vmul.f32 %v1010_v17, %v387_v7 }
  0x7c   :  { %v399_v20 = vadd.f32 %v398_v10, %v396_v8  ;;  %v404_v22 = vmul.f32 %v973_v51, %v403_v12  ;;  %v407_v25 = vmul.f32 %v993_v5, %v406_v16  ;;  %v409_v26 = vstv %s1063_s21  ;;  %p677_p2 = pnand %p676_p1, %p670_p12 }
  0x7d   :  { %v369_v24 = vadd.f32 %v368_v62, %v367_v13  ;;  %v417_v27 = vstv %s1065_s20  ;;  %v386_v28 = vadd.f32 %v385_v2, %v383_v18  ;;  %v419_v30 = vstv %s1071_s25 }
  0x7e   :  { %v402_v29 = vadd.f32 %v401_v15, %v399_v20  ;;  %v418_v21 = vmul.f32 %v952_v37, %v417_v27  ;;  %v420_v32 = vmul.f32 %v957_v41, %v419_v30  ;;  %v422_v33 = vstv %s1073_s24 }
  0x7f   :  { %372 = vst [vmem:[#allocation12 + $0x4] sm:$0x1] %v369_v24  ;;  %v425_v34 = vstv %s1078_s26  ;;  %v428_v35 = vstv %s1080_s27  ;;  %v389_v36 = vadd.f32 %v388_v19, %v386_v28  ;;  %v410_v40 = vmul.f32 %v1010_v17, %v409_v26 }
  0x80   :  { %v405_v38 = vadd.f32 %v404_v22, %v402_v29  ;;  %v423_v42 = vmul.f32 %v963_v46, %v422_v33  ;;  %v412_v43 = vstv %s1086_s1  ;;  %v421_v44 = vadd.f32 %v420_v32, %v418_v21 }
  0x81   :  { %v426_v45 = vmul.f32 %v973_v51, %v425_v34  ;;  %v429_v47 = vmul.f32 %v993_v5, %v428_v35  ;;  %v391_v48 = vadd.f32 %v390_v14, %v389_v36  ;;  %v431_v50 = vstv %s1093_s4 }
  0x82   :  { %v408_v49 = vadd.f32 %v407_v25, %v405_v38  ;;  %v439_v23 = vstv %s1095_s28  ;;  %v424_v31 = vadd.f32 %v423_v42, %v421_v44  ;;  %v441_v52 = vstv %s1100_s3 }
  0x83   :  { %v440_v39 = vmul.f32 %v952_v37, %v439_v23  ;;  %v444_v53 = vstv %s1102_s29  ;;  %394 = vst [vmem:[#allocation12 + $0x5] sm:$0x1] %v391_v48  ;;  %v442_v55 = vmul.f32 %v957_v41, %v441_v52  ;;  %v447_v57 = vstv %s1106_s30 }
  0x84   :  { %v411_v54 = vadd.f32 %v410_v40, %v408_v49  ;;  %v445_v56 = vmul.f32 %v963_v46, %v444_v53  ;;  %v427_v58 = vadd.f32 %v426_v45, %v424_v31  ;;  %v432_v59 = vmul.f32 %v1010_v17, %v431_v50 }
  0x85   :  { %v450_v60 = vstv %s1111_s6  ;;  %v443_v62 = vadd.f32 %v442_v55, %v440_v39  ;;  %v448_v37 = vmul.f32 %v973_v51, %v447_v57  ;;  %v453_v0 = vstv %s1119_s12 }
  0x86   :  { %v413_v61 = vadd.f32 %v412_v43, %v411_v54  ;;  %v430_v63 = vadd.f32 %v429_v47, %v427_v58  ;;  %v434_v1 = vstv %s1122_s13  ;;  %v451_v4 = vmul.f32 %v993_v5, %v450_v60 }
  0x87   :  { %v446_v2 = vadd.f32 %v445_v56, %v443_v62  ;;  %v454_v46 = vmul.f32 %v1010_v17, %v453_v0  ;;  %v456_v9 = vstv %s580_s15 }
  0x88   :  { %416 = vst [vmem:[#allocation12 + $0x6] sm:$0x1] %v413_v61  ;;  %v433_v41 = vadd.f32 %v432_v59, %v430_v63 }
  0x89   :  { %v449_v6 = vadd.f32 %v448_v37, %v446_v2 }
  0x8a   :  { %v435_v7 = vadd.f32 %v434_v1, %v433_v41 }
  0x8b   :  { %v452_v8 = vadd.f32 %v451_v4, %v449_v6 }
  0x8c   :  { %438 = vst [vmem:[#allocation12 + $0x7] sm:$0x1] %v435_v7 }
  0x8d   :  { %v455_v3 = vadd.f32 %v454_v46, %v452_v8 }
  0x8f   :  { %v457_v10 = vadd.f32 %v456_v9, %v455_v3 }
  0x91   :  { %460 = vst [vmem:[#allocation12 + $0x8] sm:$0x1] %v457_v10 }
  0x92   :  { %680 = shalt.err (!%p677_p2)
}
  0x93   :  { %s681_s0 = scalar_lea.hbm %s1163_s5, 144 }
  0x94   :  { %p682_p3 = scmp.ne.s32.totalorder %s1163_s5, %s681_s0  ;;  %p685_p4 = scmp.lt.u32.totalorder %s681_s0, %s1163_s5 }
  0x96   :  { %p687_p5 = pnand %p685_p4, %p682_p3 }
  0x98   :  { %690 = shalt.err (!%p687_p5)
}
  0x99   :  { %472 = dma.vmem_to_hbm [thread:$0]  %s467_s9, 144, %s1163_s5, [#allocation4], %s703_s7, %s703_s7, %s704_s8  }
  0x9a   :  { %699 = dma.done.wait [#allocation4], 144  }
  0x9b   :  { %700 = vsyncadd [#allocation4], 4294967152 }
  0x9c   :  { %476 = vsyncpa [#allocation3], 1 }
  0x9d   :  { %477 = vsyncpa [#allocation4], 1 }
  0x9e   :  { %478 = vsyncpa [#allocation5], 1 }
  0x9f   :  { %479 = vsyncpa [#allocation6], 1 }
  0xa0   :  { %480 = vsyncpa [#allocation10], 1 }

</bundles_post_ra>
